<compile_context>
chip_gen: v5e
topology: v5e:2x2
jax: 0.10.0
libtpu: 0.0.40
codegen_flags: <defaults>
</compile_context>

<pallas_src>
import functools

import jax
import jax.numpy as jnp
from jax.experimental import pallas as pl
from jax.experimental.pallas import tpu as pltpu

EPS = 1e-6  # norm_layer = partial(nn.LayerNorm, eps=1e-6)


# --------------------------------------------------------------------------
# Per-generation VMEM budget (v7x: 64 MiB phys -> ~48 MiB; v5e/v6e: 128 MiB
# phys -> ~96 MiB).  Falls back to a conservative 96 MiB if the query fails.
# --------------------------------------------------------------------------
def _block_vmem_limit():
    cap = None
    try:
        info = pltpu.get_tpu_info()
        cap = getattr(info, "vmem_capacity_bytes", None)
    except Exception:
        cap = None
    if not cap or cap <= 0:
        cap = 128 * 1024 * 1024
    return int(min(cap * 3 // 4, 100 * 1024 * 1024))


# --------------------------------------------------------------------------
# Single-buffering of grid-invariant operands (weights / biases / LN params).
# pl.Buffered(1) halves their VMEM reservation (double buffering buys nothing
# for constant index_maps).  Probe once; if unsupported on this JAX build,
# fall back to default double-buffering and say so (visible, not silent).
# --------------------------------------------------------------------------
_SINGLE_BUFFER_OK = None


def _single_buffer_supported():
    global _SINGLE_BUFFER_OK
    if _SINGLE_BUFFER_OK is None:
        def _copy(x_ref, o_ref):
            o_ref[...] = x_ref[...]
        try:
            fn = pl.pallas_call(
                _copy,
                out_shape=jax.ShapeDtypeStruct((16, 128), jnp.float32),
                grid=(2,),
                in_specs=[pl.BlockSpec((8, 128), lambda i: (0, 0),
                                       pipeline_mode=pl.Buffered(1))],
                out_specs=pl.BlockSpec((8, 128), lambda i: (i, 0)),
            )
            jax.block_until_ready(fn(jnp.zeros((8, 128), jnp.float32)))
            _SINGLE_BUFFER_OK = True
        except Exception:
            _SINGLE_BUFFER_OK = False
            print("note: pl.Buffered(1) unavailable -> weights are double-buffered "
                  "(expect ~2x weight VMEM residency)")
    return _SINGLE_BUFFER_OK


def _const_spec(shape):
    """BlockSpec for an operand that is identical at every grid step."""
    idx = lambda *_: (0,) * len(shape)
    if _single_buffer_supported():
        return pl.BlockSpec(shape, idx, pipeline_mode=pl.Buffered(1))
    return pl.BlockSpec(shape, idx)


# ----------------------------- in-kernel math -----------------------------

def _layernorm(x, g, b):
    mu = jnp.mean(x, axis=-1, keepdims=True)
    xc = x - mu
    var = jnp.mean(xc * xc, axis=-1, keepdims=True)
    return xc * jax.lax.rsqrt(var + EPS) * g + b


def _gelu_tanh(x):
    # tanh-form GELU: tanh runs on the EUP slot; |exact - tanh| is negligible
    # at the magnitudes seen here.
    c = 0.7978845608028654  # sqrt(2/pi)
    return 0.5 * x * (1.0 + jnp.tanh(c * (x + 0.044715 * x * x * x)))


# ----------------------------- Pallas kernels -----------------------------

def _patch_embed_kernel(p_ref, w_ref, b_ref, o_ref):
    # (tm, K)bf16 @ (K, E)bf16 -> f32 acc, + bias.
    # == Conv2d(kernel=stride=patch) after im2col.
    o_ref[...] = (
        jnp.dot(p_ref[...], w_ref[...], preferred_element_type=jnp.float32)
        + b_ref[...]
    )


def _block_kernel(x_ref, ln1g_ref, ln1b_ref,
                  wqkv_ref, bqkv_ref, pw_ref, pb_ref,
                  ln2g_ref, ln2b_ref,
                  fc1w_ref, fc1b_ref, fc2w_ref, fc2b_ref, o_ref,
                  *, num_heads, scale):
    f32 = jnp.float32
    bf16 = jnp.bfloat16
    x = x_ref[0]                                   # (N, C) f32 residual stream
    N, C = x.shape
    nh = num_heads
    hd = C // nh

    # --- Attention (pre-norm) ---
    h1 = _layernorm(x, ln1g_ref[...], ln1b_ref[...]).astype(bf16)
    # One packed, lane-dense matmul for q, k and v (full-width MXU).
    qkv = (jnp.dot(h1, wqkv_ref[...], preferred_element_type=f32)
           + bqkv_ref[...])                        # (N, 3C) f32
    # Split into per-head batched tensors (static lane slices; column layout
    # matches PyTorch's reshape(B,N,3,nh,hd): col = which*C + head*hd + d).
    q = jnp.stack([qkv[:, hi * hd:(hi + 1) * hd] for hi in range(nh)], axis=0)
    k = jnp.stack([qkv[:, C + hi * hd:C + (hi + 1) * hd] for hi in range(nh)], axis=0)
    v = jnp.stack([qkv[:, 2 * C + hi * hd:2 * C + (hi + 1) * hd] for hi in range(nh)], axis=0)
    q = q * scale                                  # fold scale into q, not the (N,N) scores

    s = jnp.einsum('hqd,hkd->hqk', q.astype(bf16), k.astype(bf16),
                   preferred_element_type=f32)     # (nh, N, N)
    s = s - jnp.max(s, axis=-1, keepdims=True)
    e = jnp.exp(s)
    p = e * pl.reciprocal(jnp.sum(e, axis=-1, keepdims=True), approx=True)

    o = jnp.einsum('hqk,hkd->hqd', p.astype(bf16), v.astype(bf16),
                   preferred_element_type=f32)     # (nh, N, hd)
    # Heads -> lanes (== PyTorch transpose(1,2).reshape(N, C)), then ONE
    # lane-dense (N,C)@(C,C) projection.
    oc = jnp.concatenate([o[hi] for hi in range(nh)], axis=-1).astype(bf16)
    x = x + jnp.dot(oc, pw_ref[...], preferred_element_type=f32) + pb_ref[...]

    # --- MLP (pre-norm) ---
    h2 = _layernorm(x, ln2g_ref[...], ln2b_ref[...]).astype(bf16)
    hid = jnp.dot(h2, fc1w_ref[...], preferred_element_type=f32) + fc1b_ref[...]
    hid = _gelu_tanh(hid)
    mlp = jnp.dot(hid.astype(bf16), fc2w_ref[...],
                  preferred_element_type=f32) + fc2b_ref[...]
    o_ref[0] = x + mlp


# ------------------------------- wrappers ----------------------------------

def _patchify(x_nchw, p):
    B, C, H, W = x_nchw.shape
    gh, gw = H // p, W // p
    x = x_nchw.reshape(B, C, gh, p, gw, p)
    x = x.transpose(0, 2, 4, 1, 3, 5)             # (B, gh, gw, C, p, p)
    return x.reshape(B * gh * gw, C * p * p)


def _pick_tile(dim, target=512):
    # Mem-bound matmul: biggest tile that divides `dim`, 16-row (bf16 sublane)
    # aligned so loads/stores are unmasked.
    if dim <= target:
        return dim
    for t in range(target, 0, -1):
        if dim % t == 0 and t % 16 == 0:
            return t
    return dim


def patch_embed(patches, w2d, bias):
    M, K = patches.shape
    E = w2d.shape[1]
    tm = _pick_tile(M, 512)                        # row tiles -> pipelined DMA
    return pl.pallas_call(
        _patch_embed_kernel,
        out_shape=jax.ShapeDtypeStruct((M, E), jnp.float32),
        grid=(M // tm,),
        in_specs=[pl.BlockSpec((tm, K), lambda i: (i, 0)),
                  _const_spec((K, E)),
                  _const_spec((1, E))],
        out_specs=pl.BlockSpec((tm, E), lambda i: (i, 0)),
        compiler_params=pltpu.CompilerParams(dimension_semantics=("parallel",)),
    )(patches, w2d, bias.reshape(1, E))


def run_block(x, blk, *, num_heads):
    B, N, C = x.shape
    H = blk["fc1_w"].shape[1]
    hd = C // num_heads
    scale = float(hd ** -0.5)
    kern = functools.partial(_block_kernel, num_heads=num_heads, scale=scale)

    in_specs = [
        pl.BlockSpec((1, N, C), lambda b: (b, 0, 0)),
        _const_spec((1, C)), _const_spec((1, C)),
        _const_spec((C, 3 * C)), _const_spec((1, 3 * C)),
        _const_spec((C, C)), _const_spec((1, C)),
        _const_spec((1, C)), _const_spec((1, C)),
        _const_spec((C, H)), _const_spec((1, H)),
        _const_spec((H, C)), _const_spec((1, C)),
    ]
    return pl.pallas_call(
        kern,
        out_shape=jax.ShapeDtypeStruct((B, N, C), jnp.float32),
        grid=(B,),
        in_specs=in_specs,
        out_specs=pl.BlockSpec((1, N, C), lambda b: (b, 0, 0)),
        compiler_params=pltpu.CompilerParams(
            dimension_semantics=("parallel",),
            vmem_limit_bytes=_block_vmem_limit()),
    )(x, blk["ln1_g"], blk["ln1_b"],
      blk["wqkv"], blk["bqkv"], blk["pw"], blk["pb"],
      blk["ln2_g"], blk["ln2_b"],
      blk["fc1_w"], blk["fc1_b"], blk["fc2_w"], blk["fc2_b"])


def vit_forward(x_nchw, params, *, patch_size, num_heads):
    B = x_nchw.shape[0]
    E = params["pos_embed"].shape[-1]
    patches = _patchify(x_nchw, patch_size).astype(jnp.bfloat16)  # glue: im2col
    tok = patch_embed(patches, params["conv_w2d"], params["conv_b"])
    tok = tok.reshape(B, -1, E)                                   # (B, num_patches, E)
    cls = jnp.broadcast_to(params["cls_token"], (B, 1, E))
    x = jnp.concatenate([cls, tok], axis=1)                       # (B, N, E)
    x = x + params["pos_embed"]                                   # pos_drop = identity
    for blk in params["blocks"]:
        x = run_block(x, blk, num_heads=num_heads)
    # Final LayerNorm on the cls token only: (B, C) is trivially small, so it is
    # done in plain JAX instead of a per-row pallas_call.
    cls_tok = x[:, 0, :]
    mu = jnp.mean(cls_tok, axis=-1, keepdims=True)
    var = jnp.mean((cls_tok - mu) ** 2, axis=-1, keepdims=True)
    out = (cls_tok - mu) * jax.lax.rsqrt(var + EPS) * params["norm_g"] + params["norm_b"]
    return out                                                    # pre_logits = Identity


# ------------------------------ parameters ---------------------------------

def init_params(key, *, img_size, patch_size, in_c, embed_dim, depth,
                num_heads, mlp_ratio):
    gh = img_size // patch_size
    num_patches = gh * gh
    N = num_patches + 1
    C = embed_dim
    H = int(C * mlp_ratio)
    K = in_c * patch_size * patch_size
    keys = jax.random.split(key, 4 + depth)

    def trunc(k, shape, std):
        return std * jax.random.truncated_normal(k, -2.0, 2.0, shape, jnp.float32)

    # Conv2d: kaiming_normal(mode='fan_out'), bias zeros
    conv_w = jax.random.normal(keys[0], (C, in_c, patch_size, patch_size), jnp.float32)
    conv_w = conv_w * (2.0 / (C * patch_size * patch_size)) ** 0.5

    params = {
        "conv_w2d": conv_w.reshape(C, K).T.astype(jnp.bfloat16),   # (K, E)
        "conv_b": jnp.zeros((C,), jnp.float32),
        "cls_token": trunc(keys[1], (1, 1, C), 0.02),
        "pos_embed": trunc(keys[2], (1, N, C), 0.02),
        "norm_g": jnp.ones((1, C), jnp.float32),
        "norm_b": jnp.zeros((1, C), jnp.float32),
        "blocks": [],
    }
    for d in range(depth):
        bk = jax.random.split(keys[4 + d], 4)
        params["blocks"].append({
            "ln1_g": jnp.ones((1, C), jnp.float32),
            "ln1_b": jnp.zeros((1, C), jnp.float32),
            # Packed qkv weight in x @ W form: (C, 3C), columns ordered
            # [q heads..., k heads..., v heads...] exactly like nn.Linear(C,3C).
            "wqkv": trunc(bk[0], (C, 3 * C), 0.01).astype(jnp.bfloat16),
            "bqkv": jnp.zeros((1, 3 * C), jnp.float32),            # qkv_bias=True, zero init
            "pw": trunc(bk[1], (C, C), 0.01).astype(jnp.bfloat16), # proj in x @ W form
            "pb": jnp.zeros((1, C), jnp.float32),
            "ln2_g": jnp.ones((1, C), jnp.float32),
            "ln2_b": jnp.zeros((1, C), jnp.float32),
            "fc1_w": trunc(bk[2], (C, H), 0.01).astype(jnp.bfloat16),
            "fc1_b": jnp.zeros((1, H), jnp.float32),
            "fc2_w": trunc(bk[3], (H, C), 0.01).astype(jnp.bfloat16),
            "fc2_b": jnp.zeros((1, C), jnp.float32),
        })
    return params


# --------------------------- plain-JAX reference ----------------------------

def reference_forward(x_nchw, params, *, patch_size, num_heads):
    f32 = jnp.float32
    B = x_nchw.shape[0]
    C = params["pos_embed"].shape[-1]
    nh = num_heads
    hd = C // nh
    scale = hd ** -0.5

    def ln(t, g, b):
        mu = jnp.mean(t, axis=-1, keepdims=True)
        var = jnp.mean((t - mu) ** 2, axis=-1, keepdims=True)
        return (t - mu) / jnp.sqrt(var + EPS) * g + b

    tok = _patchify(x_nchw, patch_size) @ params["conv_w2d"].astype(f32) + params["conv_b"]
    x = jnp.concatenate(
        [jnp.broadcast_to(params["cls_token"], (B, 1, C)), tok.reshape(B, -1, C)], axis=1)
    x = x + params["pos_embed"]
    N = x.shape[1]
    for blk in params["blocks"]:
        h = ln(x, blk["ln1_g"], blk["ln1_b"])
        qkv = h @ blk["wqkv"].astype(f32) + blk["bqkv"]
        qkv = qkv.reshape(B, N, 3, nh, hd).transpose(2, 0, 3, 1, 4)  # (3,B,nh,N,hd)
        q, k, v = qkv[0], qkv[1], qkv[2]
        a = jax.nn.softmax(jnp.einsum('bhqd,bhkd->bhqk', q, k) * scale, axis=-1)
        o = jnp.einsum('bhqk,bhkd->bhqd', a, v)
        o = o.transpose(0, 2, 1, 3).reshape(B, N, C)
        x = x + o @ blk["pw"].astype(f32) + blk["pb"]
        h2 = ln(x, blk["ln2_g"], blk["ln2_b"])
        hid = jax.nn.gelu(h2 @ blk["fc1_w"].astype(f32) + blk["fc1_b"], approximate=False)
        x = x + (hid @ blk["fc2_w"].astype(f32) + blk["fc2_b"])
    return ln(x[:, 0, :], params["norm_g"], params["norm_b"])


# ---------------------------------- main ------------------------------------

if __name__ == "__main__":
    # Small config consistent with the module: embed_dim divisible by num_heads=3,
    # image divisible by the patch size.
    B, in_c, img_size, patch_size = 2, 4, 12, 3
    embed_dim, depth, num_heads, mlp_ratio = 48, 2, 3, 4.0

    key = jax.random.PRNGKey(0)
    kx, kp = jax.random.split(key)
    x = jax.random.normal(kx, (B, in_c, img_size, img_size), jnp.float32)
    params = init_params(kp, img_size=img_size, patch_size=patch_size, in_c=in_c,
                         embed_dim=embed_dim, depth=depth, num_heads=num_heads,
                         mlp_ratio=mlp_ratio)

    out = vit_forward(x, params, patch_size=patch_size, num_heads=num_heads)
    out = jax.block_until_ready(out)

    ref = reference_forward(x, params, patch_size=patch_size, num_heads=num_heads)
    assert out.shape == (B, embed_dim), out.shape
    assert bool(jnp.all(jnp.isfinite(out)))
    assert bool(jnp.allclose(out, ref, atol=2e-2, rtol=2e-2)), \
        float(jnp.max(jnp.abs(out - ref)))
    print("KERNEL_OK")
</pallas_src>

<mosaic_0001>
module attributes {stable_mosaic.version = 11 : i64} {
  func.func @_copy(%arg0: i32, %arg1: memref<8x128xf32, #tpu.memory_space<vmem>>, %arg2: memref<8x128xf32, #tpu.memory_space<vmem>>) attributes {dimension_semantics = [#tpu.dimension_semantics<arbitrary>], iteration_bounds = array<i64: 2>, scalar_prefetch = 0 : i64, scratch_operands = 0 : i64, tpu.core_type = #tpu.core_type<tc>, window_params = [{pipeline_mode = #tpu.pipeline_mode<synchronous>, transform_indices = @transform_0, window_bounds = array<i64: 8, 128>}, {transform_indices = @transform_1, window_bounds = array<i64: 8, 128>}]} {
    %c0 = arith.constant 0 : index
    %c0_0 = arith.constant 0 : index
    %0 = vector.load %arg1[%c0, %c0_0] : memref<8x128xf32, #tpu.memory_space<vmem>>, vector<8x128xf32>
    %c0_1 = arith.constant 0 : index
    %c0_2 = arith.constant 0 : index
    %1 = vector.load %arg2[%c0_1, %c0_2] : memref<8x128xf32, #tpu.memory_space<vmem>>, vector<8x128xf32>
    tpu.vector_store %arg2[%c0_1, %c0_2], %0 {strides = array<i32>} : memref<8x128xf32, #tpu.memory_space<vmem>>, vector<8x128xf32>,
    return
  }
  func.func @transform_0(%arg0: i32) -> (i32, i32) {
    %c0_i32 = arith.constant 0 : i32
    %c0_i32_0 = arith.constant 0 : i32
    %c0_i32_1 = arith.constant 0 : i32
    return %c0_i32, %c0_i32_0 : i32, i32
  }
  func.func @transform_1(%arg0: i32) -> (i32, i32) {
    %c0_i32 = arith.constant 0 : i32
    %c0_i32_0 = arith.constant 0 : i32
    return %arg0, %c0_i32 : i32, i32
  }
}

module attributes {stable_mosaic.version = 11 : i64} {
  func.func @_patch_embed_kernel(%arg0: i32, %arg1: memref<32x36xbf16, #tpu.memory_space<vmem>>, %arg2: memref<36x48xbf16, #tpu.memory_space<vmem>>, %arg3: memref<1x48xf32, #tpu.memory_space<vmem>>, %arg4: memref<32x48xf32, #tpu.memory_space<vmem>>) attributes {dimension_semantics = [#tpu.dimension_semantics<parallel>], iteration_bounds = array<i64: 1>, scalar_prefetch = 0 : i64, scratch_operands = 0 : i64, tpu.core_type = #tpu.core_type<tc>, window_params = [{transform_indices = @transform_0, window_bounds = array<i64: 32, 36>}, {pipeline_mode = #tpu.pipeline_mode<synchronous>, transform_indices = @transform_1, window_bounds = array<i64: 36, 48>}, {pipeline_mode = #tpu.pipeline_mode<synchronous>, transform_indices = @transform_2, window_bounds = array<i64: 1, 48>}, {transform_indices = @transform_3, window_bounds = array<i64: 32, 48>}]} {
    %c0 = arith.constant 0 : index
    %c0_0 = arith.constant 0 : index
    %0 = vector.load %arg1[%c0, %c0_0] : memref<32x36xbf16, #tpu.memory_space<vmem>>, vector<32x36xbf16>
    %c0_1 = arith.constant 0 : index
    %c0_2 = arith.constant 0 : index
    %1 = vector.load %arg2[%c0_1, %c0_2] : memref<36x48xbf16, #tpu.memory_space<vmem>>, vector<36x48xbf16>
    %cst = arith.constant dense<0.000000e+00> : vector<32x48xf32>
    %2 = tpu.matmul %0, %1, %cst {dimension_numbers = #tpu.dot_dimension_numbers<[1], [0], [0], [1], [0, 0, 1, 1], [], []>} : vector<32x36xbf16>, vector<36x48xbf16>, vector<32x48xf32> -> vector<32x48xf32>
    %c0_3 = arith.constant 0 : index
    %c0_4 = arith.constant 0 : index
    %3 = vector.load %arg3[%c0_3, %c0_4] : memref<1x48xf32, #tpu.memory_space<vmem>>, vector<1x48xf32>
    %4 = vector.broadcast %3 : vector<1x48xf32> to vector<32x48xf32>
    %5 = arith.addf %2, %4 : vector<32x48xf32>
    %c0_5 = arith.constant 0 : index
    %c0_6 = arith.constant 0 : index
    %6 = vector.load %arg4[%c0_5, %c0_6] : memref<32x48xf32, #tpu.memory_space<vmem>>, vector<32x48xf32>
    tpu.vector_store %arg4[%c0_5, %c0_6], %5 {strides = array<i32>} : memref<32x48xf32, #tpu.memory_space<vmem>>, vector<32x48xf32>,
    return
  }
  func.func @transform_0(%arg0: i32) -> (i32, i32) {
    %c0_i32 = arith.constant 0 : i32
    %c0_i32_0 = arith.constant 0 : i32
    return %arg0, %c0_i32 : i32, i32
  }
  func.func @transform_1(%arg0: i32) -> (i32, i32) {
    %c0_i32 = arith.constant 0 : i32
    %c0_i32_0 = arith.constant 0 : i32
    %c0_i32_1 = arith.constant 0 : i32
    return %c0_i32, %c0_i32_0 : i32, i32
  }
  func.func @transform_2(%arg0: i32) -> (i32, i32) {
    %c0_i32 = arith.constant 0 : i32
    %c0_i32_0 = arith.constant 0 : i32
    %c0_i32_1 = arith.constant 0 : i32
    return %c0_i32, %c0_i32_0 : i32, i32
  }
  func.func @transform_3(%arg0: i32) -> (i32, i32) {
    %c0_i32 = arith.constant 0 : i32
    %c0_i32_0 = arith.constant 0 : i32
    return %arg0, %c0_i32 : i32, i32
  }
}

</mosaic_0001>

<bundles_post_ra>
// kernel: tpu_custom_call.1
= control target key start
LH: loop header
LB: loop body
LE: loop exit
PB: predicated region body
PF: predicated region fallthrough
CT: control target
= control target key end

     0   :  { %6 = vsyncpa [#allocation3], 0  ;;  %s440_s0 = inlined_call_operand.hbm [shape: f32[8,128], index: 0, kind: input, shape index: {}]   ;;  %s441_s1 = inlined_call_operand.hbm [shape: f32[16,128], index: 1, kind: output, shape index: {}]  }
   0x1   :  { %7 = vsyncpa [#allocation4], 0 }
   0x2   :  { %9 = vsyncpa [#allocation4 + $0x1], 0  ;;  %s356_s6 = smov 0   ;;  %s358_s7 = smov 0  }
   0x3   :  { %s360_s8 = smov 0   ;;  %s362_s9 = smov 0  }
   0x4 LB: > { %s377_s10 = sadd.s32 4294967295, %s343_s9   ;;  %s187_s11 = sadd.s32 4294967294, %s343_s9   ;;  %s343_s9 = sphi %s362_s9, %s447_s9   ;;  %s339_s8 = sphi %s360_s8, %s446_s8   ;;  %s335_s7 = sphi %s358_s7, %s445_s7   ;;  %s331_s6 = sphi %s356_s6, %s444_s6  }
   0x5   : > { %s381_s12 = sadd.s32 1, %s343_s9   ;;  %s43_s13 = sadd.s32 1, %s339_s8 }
   0x6   : > { %s40_s14 = ssub.s32 %s343_s9, %s381_s12  ;;  %p53_p0 = scmp.ne.s32.totalorder %s339_s8, %s335_s7 }
   0x7   : > { %p41_p1 = scmp.eq.s32.totalorder %s40_s14, 0  ;;  %p54_p2 = scmp.eq.s32.totalorder %s377_s10, 1 }
   0x8   : > { %p59_p3 = scmp.ne.s32.totalorder %s335_s7, %s331_s6  ;;  %p60_p4 = scmp.eq.s32.totalorder %s187_s11, 1 }
   0x9   : > { %s392_s15 = scalar_select %p41_p1, %s339_s8, %s43_s13  }
   0xa   : > { %p394_p5 = por %p54_p2, %p53_p0  ;;  %p398_p6 = por %p60_p4, %p59_p3 }
   0xb   : > { %p188_p7 = scmp.ge.s32.totalorder %s343_s9, 1  ;;  %p67_p8 = scmp.lt.s32.totalorder %s343_s9, 3 }
   0xc   : > { %p211_p9 = scmp.eq.s32.totalorder %s377_s10, 0  ;;  %s79_s20 = sshll.u32 %s440_s0, 4  ;;  %s80_s20 = int_to_ptr.hbm [resolvable:$true] %s79_s20 }
   0xd   : > { %p68_p10 = pnand %p188_p7, %p67_p8  ;;  %s345_s21 = smov [#allocation2]  }
   0xe   : > { %s81_s22 = sshll.u32 %s345_s21, 4  ;;  %s82_s22 = int_to_ptr.vmem [resolvable:$true] %s81_s22 }
   0xf   : > { %p203_p11 = pneg %p68_p10  ;;  %94 = sbr.rel (%p68_p10) target bundleno = 37 (0x25), region = 24 }
  0x11   : > { %p204_p12 = pnand %p211_p9, %p203_p11 }
  0x13   : > { %206 = dma.hbm_to_vmem [thread:$0]  (!%p204_p12), %s80_s20, 128, %s82_s22, [#allocation3]  }
  0x14   : > { %322 = dma.done.wait (%p211_p9), [#allocation3], 128  }
  0x15   : > { %324 = vsyncadd (%p211_p9), [#allocation3], 4294967168  ;;  %s107_s23 = sand.u32 1, %s335_s7   ;;  %s194_s24 = sshll.u32 %s377_s10, 3  ;;  %v110_v0 = vld [vmem:[#allocation2] sm:$0xff] }
  0x16   : > { %s192_s25 = sshll.u32 %s107_s23, 3  ;;  %s123_s28 = scalar_lea.hbm %s441_s1, %s194_s24 }
  0x17   : > { %s109_s29 = scalar_lea.vmem [#allocation5], %s192_s25  ;;  %s127_s2 = sshll.u32 %s123_s28, 4  ;;  %s128_s2 = int_to_ptr.hbm [resolvable:$true] %s127_s2 }
  0x18   : > { %s125_s30 = sshll.u32 %s109_s29, 4  ;;  %111 = vst [vmem:[%s109_s29] sm:$0xff] %v110_v0  ;;  %s113_s3 = scalar_lea.sflag [#allocation4], %s107_s23  ;;  %s126_s30 = int_to_ptr.vmem [resolvable:$true] %s125_s30 }
  0x19   : > { %s291_s4 = sshra.s32 %s128_s2, 4  ;;  %s297_s13 = scalar_lea.hbm %s441_s1, 16  ;;  %s292_s4 = int_to_ptr.hbm [resolvable:$true] %s291_s4 }
  0x1a   : > { %s293_s5 = scalar_lea.hbm %s292_s4, 8  ;;  %p298_p2 = scmp.lt.s32.totalorder %s292_s4, %s441_s1 }
  0x1b   : > { %p294_p13 = scmp.ne.s32.totalorder %s292_s4, %s293_s5  ;;  %p299_p3 = scmp.lt.s32.totalorder %s297_s13, %s293_s5 }
  0x1d   : > { %p295_p0 = pnand %p294_p13, %p394_p5  ;;  %p300_p4 = por %p299_p3, %p298_p2 }
  0x1f   : > { %p296_p1 = pneg %p295_p0 }
  0x21   : > { %p301_p7 = pnand %p300_p4, %p296_p1 }
  0x23   : > { %304 = shalt.err (!%p301_p7)
}
  0x24   : > { %201 = dma.vmem_to_hbm [thread:$0]  (%p394_p5), %s126_s30, 128, %s128_s2, %s113_s3  }
  0x25 PF: > { %p213_p8 = scmp.ge.s32.totalorder %s343_s9, 2  ;;  %s139_s19 = sand.u32 1, %s331_s6  }
  0x26   : > { %s140_s20 = scalar_lea.sflag [#allocation4], %s139_s19 }
  0x27   : > { %p208_p9 = pnand %p213_p8, %p398_p6 }
  0x29   : > { %p209_p10 = pneg %p208_p9 }
  0x2b   : > { %326 = dma.done.wait (%p209_p10), %s140_s20, 128  }
  0x2c   : > { %328 = vsyncadd (%p209_p10), %s140_s20, 4294967168  ;;  %p12_p11 = scmp.ge.s32.totalorder %s381_s12, 4   ;;  %s444_s6 = smov %s335_s7 }
  0x2d   : > { %s445_s7 = smov %s339_s8  ;;  %s446_s8 = smov %s392_s15 }
  0x2e   : > { %s447_s9 = smov %s381_s12  ;;  %14 = sbr.rel (!%p12_p11) target bundleno = 4 (0x4), region = 61 }
  0x33   :  { %146 = vsyncpa [#allocation3], 1 }
  0x34   :  { %148 = vsyncpa [#allocation3 + $0x1], 1 }
  0x35   :  { %149 = vsyncpa [#allocation4], 1 }
  0x36   :  { %151 = vsyncpa [#allocation4 + $0x1], 1 }

// kernel: tpu_custom_call.1
= control target key start
LH: loop header
LB: loop body
LE: loop exit
PB: predicated region body
PF: predicated region fallthrough
CT: control target
= control target key end

     0   :  { %8 = vsyncpa [#allocation3], 0  ;;  %s295_s0 = inlined_call_operand.hbm [shape: bf16[32,36], index: 0, kind: input, shape index: {}]   ;;  %s296_s1 = inlined_call_operand.hbm [shape: bf16[36,48], index: 1, kind: input, shape index: {}]   ;;  %s297_s2 = inlined_call_operand.vmem [shape: f32[1,48], index: 2, kind: input, shape index: {}]   ;;  %s298_s3 = inlined_call_operand.hbm [shape: f32[32,48], index: 3, kind: output, shape index: {}]  }
   0x1   :  { %9 = vsyncpa [#allocation6], 0 }
   0x2   :  { %10 = vsyncpa [#allocation4], 0  ;;  %s15_s14 = sshll.u32 %s295_s0, 4  ;;  %s252_s15 = smov [#allocation2]   ;;  %s16_s14 = int_to_ptr.hbm [resolvable:$true] %s15_s14 }
   0x3   :  { %s17_s16 = sshll.u32 %s252_s15, 4  ;;  %s28_s19 = sshll.u32 %s296_s1, 4  ;;  %s18_s16 = int_to_ptr.vmem [resolvable:$true] %s17_s16  ;;  %s29_s19 = int_to_ptr.hbm [resolvable:$true] %s28_s19 }
   0x4   :  { %s253_s20 = smov 64   ;;  %s254_s21 = smov 4  }
   0x5   :  { %23 = dma.hbm_to_vmem [thread:$0]  %s16_s14, 256, %s18_s16, [#allocation3], %s253_s20, %s253_s20, %s254_s21  }
   0x6   :  { %s255_s22 = smov [#allocation5]  }
   0x7   :  { %s30_s23 = sshll.u32 %s255_s22, 4  ;;  %s31_s23 = int_to_ptr.vmem [resolvable:$true] %s30_s23 }
   0x8   :  { %36 = dma.hbm_to_vmem [thread:$0]  %s29_s19, 320, %s31_s23, [#allocation6], %s253_s20, %s253_s20, %s254_s21  }
   0x9   :  { %246 = dma.done.wait [#allocation3], 256  }
   0xa   :  { %247 = vsyncadd [#allocation3], 4294967040 }
   0xb   :  { %248 = dma.done.wait [#allocation6], 320  }
   0xc   :  { %249 = vsyncadd [#allocation6], 4294966976  ;;  %v56_v0 = vld [vmem:[#allocation5 + $0x10] sm:$0x3]  ;;  %vm93_vm0 = vcmask 1041408   ;;  %v162_v4 = vld [vmem:[#allocation5 + $0x8] sm:$0xff] }
   0xd   :  { %v80_v1 = vunpack.c.l.b16 %v56_v0  ;;  %v161_v5 = vld [vmem:[#allocation5] sm:$0xff]  ;;  %v159_v6 = vld [vmem:[#allocation2] sm:$0xff]  ;;  %v160_v7 = vld [vmem:[#allocation2 + $0x8] sm:$0xff]  ;;  %vm86_vm1 = vcmask 293888   ;;  %vm116_vm2 = vcmask 392192   ;;  %s256_s24 = smov [#allocation7]  }
   0xe   :  { %v173_v8 = vld [vmem:[%s297_s2] ss:$0 sm:$0xff]  ;;  %s125_s25 = sshll.u32 %s256_s24, 4  ;;  %s127_s28 = sshll.u32 %s298_s3, 4  ;;  %s126_s25 = int_to_ptr.vmem [resolvable:$true] %s125_s25  ;;  %s128_s28 = int_to_ptr.hbm [resolvable:$true] %s127_s28 }
   0xf   :  { %v83_v2 = vpack.c.b16 %v80_v1, %v80_v1  ;;  %s257_s2 = smov 128   ;;  %s258_s29 = smov 8  }
  0x11   :  { %v95_v3 = vsel %vm93_vm0, %v83_v2, 0 }
  0x12   :  { %102 = vmatpush.bf16.msra.mxu0 %v95_v3  ;;  %163 = vmatpush.bf16.msra.mxu1 %v95_v3 }
  0x16   :  { %103 = vmatpush.bf16.msra.mxu0 %v162_v4  ;;  %164 = vmatpush.bf16.msra.mxu1 %v162_v4 }
  0x1a   :  { %104 = vmatpush.bf16.msra.mxu0 %v161_v5  ;;  %165 = vmatpush.bf16.msra.mxu1 %v161_v5 }
  0x1d   :  { %157 = vmatmul.msk.bf16.vlgmr.msra.gmra.mxu0 %vm86_vm1, %v159_v6  ;;  %158 = vmatmul.msk.bf16.vlgmr.msra.gmra.mxu1 %vm86_vm1, %v160_v7 }
  0x9a   :  { %v106_v9 = vpop.f32.mrf.mxu0  ;;  %v111_v10 = vpop.f32.mrf.mxu1 }
  0x9b   :  { %v107_v11 = vadd.f32 %v173_v8, %v106_v9  ;;  %v112_v12 = vadd.f32 %v173_v8, %v111_v10 }
  0x9d   :  { %117 = vst.msk [vmem:[#allocation7] sm:$0xff] %vm116_vm2, %v107_v11 }
  0x9e   :  { %119 = vst.msk [vmem:[#allocation7 + $0x10] sm:$0xff] %vm116_vm2, %v112_v12 }
  0xa2   :  { %v108_v13 = vpop.f32.mrf.mxu0  ;;  %v113_v14 = vpop.f32.mrf.mxu1 }
  0xa3   :  { %v109_v15 = vadd.f32 %v173_v8, %v108_v13  ;;  %v114_v16 = vadd.f32 %v173_v8, %v113_v14 }
  0xa5   :  { %118 = vst.msk [vmem:[#allocation7 + $0x8] sm:$0xff] %vm116_vm2, %v109_v15 }
  0xa6   :  { %120 = vst.msk [vmem:[#allocation7 + $0x18] sm:$0xff] %vm116_vm2, %v114_v16 }
  0xa7   :  { %133 = dma.vmem_to_hbm [thread:$0]  %s126_s25, 512, %s128_s28, [#allocation4], %s257_s2, %s257_s2, %s258_s29  }
  0xa8   :  { %250 = dma.done.wait [#allocation4], 512  }
  0xa9   :  { %251 = vsyncadd [#allocation4], 4294966784 }
  0xaa   :  { %138 = vsyncpa [#allocation3], 1 }
  0xab   :  { %139 = vsyncpa [#allocation6], 1 }
  0xac   :  { %140 = vsyncpa [#allocation4], 1 }

</bundles_post_ra>
